<compile_context>
chip_gen: v5e
topology: v5e:2x2
jax: 0.10.0
libtpu: 0.0.40
codegen_flags: <defaults>
</compile_context>

<pallas_src>
import jax
import jax.numpy as jnp
import numpy as np
from jax.experimental import pallas as pl
from jax.experimental.pallas import tpu as pltpu

# Fixed module constants (baked in at compile time).
_W_EDGE = 0.5          # weight on the 8 neighbours
_W_CENTER = 0.2        # weight on the centre tap
_BIAS = -1.0
# conv = 0.5*S9 - 0.3*x - 1 ; (0 < conv < 1)  <=>  (2 < S9 - 0.6*x < 4)
_T_XCOEF = (_W_CENTER - _W_EDGE) / _W_EDGE     # -0.6
_T_LO = (0.0 - _BIAS) / _W_EDGE                # 2.0
_T_HI = (1.0 - _BIAS) / _W_EDGE                # 4.0

_LANE = 128
_DEFAULT_BLOCK_BYTES = 4 * 1024 * 1024         # per-input-block target (fits v7x)
_MAX_BLOCK_BYTES = 4 * 1024 * 1024             # hard cap on the minimal block
_VMEM_LIMIT_BYTES = 48 * 1024 * 1024           # < v7x physical 64 MiB


def _roll(x, shift, axis):
    """Circular shift along `axis`; usage here is symmetric (+1 and -1 summed)."""
    size = x.shape[axis]
    shift = shift % size
    if shift == 0:
        return x
    if axis == x.ndim - 1:
        return pltpu.roll(x, shift, axis)      # lane rotation -> XLU slot
    # Sublane / major-axis shift: concat-of-slices lowering (major-axis concat
    # is pure vreg renumbering, no lane/sublane movement).
    return jnp.roll(x, shift, axis)


def _make_gol_kernel(h_axis, w_axis):
    """Kernel factory; h_axis/w_axis are the spatial axes of the VMEM block."""
    def kernel(x_ref, o_ref):
        x = x_ref[...]
        # Separable circular 3x3 box sum: 2 shifts in W, 2 shifts in H.
        row = x + _roll(x, 1, w_axis) + _roll(x, -1, w_axis)
        s9 = row + _roll(row, 1, h_axis) + _roll(row, -1, h_axis)
        # Bias and 0.5 scale folded into the thresholds (one mul + one add).
        t = s9 + _T_XCOEF * x
        o_ref[...] = jnp.logical_and(t > _T_LO, t < _T_HI).astype(o_ref.dtype)
    return kernel


def _plan_lane_tiles(nb, plane_bytes, vmem_block_bytes):
    """Boards per grid step (multiple of 128) and padded board count."""
    n_tile = max(_LANE, (vmem_block_bytes // plane_bytes) // _LANE * _LANE)
    npad = pl.cdiv(nb, _LANE) * _LANE
    if npad >= 2 * _LANE:
        # Keep >= 2 grid steps so the "parallel" axis can shard across the two
        # v7x TensorCores (no effect on single-TC v5e/v6e).
        n_tile = min(n_tile, max(_LANE, (npad // 2) // _LANE * _LANE))
    n_tile = min(n_tile, npad)
    npad = pl.cdiv(npad, n_tile) * n_tile
    return n_tile, npad


def _launch_boards_last(xb, n_tile):
    """xb: (H, W, Npad) f32 with Npad % n_tile == 0, boards on the lane axis."""
    h, w, npad = xb.shape
    assert npad % n_tile == 0
    return pl.pallas_call(
        _make_gol_kernel(h_axis=0, w_axis=1),
        out_shape=jax.ShapeDtypeStruct((h, w, npad), jnp.float32),
        grid_spec=pltpu.PrefetchScalarGridSpec(
            num_scalar_prefetch=0,
            grid=(npad // n_tile,),
            in_specs=[pl.BlockSpec((h, w, n_tile), lambda i: (0, 0, i))],
            out_specs=pl.BlockSpec((h, w, n_tile), lambda i: (0, 0, i)),
        ),
        compiler_params=pltpu.CompilerParams(
            dimension_semantics=("parallel",),
            vmem_limit_bytes=_VMEM_LIMIT_BYTES),
    )(xb)


def _launch_native(xr, vmem_block_bytes):
    """xr: (N, H, W) f32 with W already lane-dense; zero wrapper copies."""
    nb, h, w = xr.shape
    board_bytes = h * w * 4
    # TODO(synk): boards larger than the per-block budget need an H-strip grid
    # axis with a 1-row circular halo (manual DMA of the wrapped rows).
    assert board_bytes <= _MAX_BLOCK_BYTES, (
        f"{h}x{w} f32 board ({board_bytes} B) exceeds the per-block VMEM budget "
        f"({_MAX_BLOCK_BYTES} B); H-strip halo tiling not implemented")
    n_tile = max(1, min(nb, vmem_block_bytes // board_bytes))
    if nb >= 2:
        n_tile = min(n_tile, pl.cdiv(nb, 2))   # >= 2 grid steps for v7x
    grid = pl.cdiv(nb, n_tile)                 # ragged last block is fine
    return pl.pallas_call(
        _make_gol_kernel(h_axis=1, w_axis=2),
        out_shape=jax.ShapeDtypeStruct((nb, h, w), jnp.float32),
        grid_spec=pltpu.PrefetchScalarGridSpec(
            num_scalar_prefetch=0,
            grid=(grid,),
            in_specs=[pl.BlockSpec((n_tile, h, w), lambda i: (i, 0, 0))],
            out_specs=pl.BlockSpec((n_tile, h, w), lambda i: (i, 0, 0)),
        ),
        compiler_params=pltpu.CompilerParams(
            dimension_semantics=("parallel",),
            vmem_limit_bytes=_VMEM_LIMIT_BYTES),
    )(xr)


def game_of_life_boards_last(xb, *, vmem_block_bytes=_DEFAULT_BLOCK_BYTES):
    """Copy-free entry point: (H, W, N) f32 -> (H, W, N) f32 of {0.0, 1.0}."""
    h, w, nb = xb.shape
    assert h * w * 4 * _LANE <= _MAX_BLOCK_BYTES, (
        "board too large for the boards-last path; "
        "TODO(synk): H-strip grid axis with 1-row circular halo")
    n_tile, npad = _plan_lane_tiles(nb, h * w * 4, vmem_block_bytes)
    if npad != nb:
        xb = jnp.pad(xb, ((0, 0), (0, 0), (0, npad - nb)))
    out = _launch_boards_last(xb, n_tile)
    return out if npad == nb else out[:, :, :nb]


def game_of_life(x, *, vmem_block_bytes=_DEFAULT_BLOCK_BYTES):
    """Module contract: x (N, 1, H, W) f32 -> (N, 1, H, W) f32 of {0.0, 1.0}."""
    n, c, h, w = x.shape
    assert c == 1, "module is Conv2d(1, 1, ...)"
    nb = n * c
    xr = x.reshape(nb, h, w)                          # free view, no copy

    if w % _LANE == 0:
        # Already lane-dense in native layout: no transposes, no padding.
        return _launch_native(xr, vmem_block_bytes).reshape(n, c, h, w)

    # Small / odd-width boards: boards-last layout so the board index sits on
    # the 128-wide lane axis (unmasked lane-dense stores).  Exactly one fused
    # pad+transpose copy in, one slice+transpose copy out.
    assert h * w * 4 * _LANE <= _MAX_BLOCK_BYTES, (
        "board too large for the boards-last path; "
        "TODO(synk): H-strip grid axis with 1-row circular halo")
    n_tile, npad = _plan_lane_tiles(nb, h * w * 4, vmem_block_bytes)
    if npad != nb:
        xr = jnp.pad(xr, ((0, npad - nb), (0, 0), (0, 0)))
    xb = jnp.transpose(xr, (1, 2, 0))                 # one HBM copy in
    yb = _launch_boards_last(xb, n_tile)
    y = jnp.transpose(yb, (2, 0, 1))[:nb]             # one HBM copy out
    return y.reshape(n, c, h, w)
    # TODO(synk): optional bf16/int8 streaming I/O would ~2-4x the bandwidth
    # bound but changes the module's f32-in/f32-out contract.


def _reference(x):
    """Pure-JAX reference: direct 9-tap circular conv + strict thresholds."""
    w3 = np.array([[0.5, 0.5, 0.5],
                   [0.5, 0.2, 0.5],
                   [0.5, 0.5, 0.5]], dtype=np.float32)
    acc = jnp.zeros_like(x)
    for ky in range(3):
        for kx in range(3):
            acc = acc + w3[ky, kx] * jnp.roll(
                jnp.roll(x, -(ky - 1), axis=2), -(kx - 1), axis=3)
    acc = acc + _BIAS
    return jnp.where((acc > 0.0) & (acc < 1.0), 1.0, 0.0)


if __name__ == "__main__":
    key = jax.random.PRNGKey(0)
    k1, k2, k3 = jax.random.split(key, 3)

    # Case 1: small boards (boards-last path, single grid step).
    x1 = jax.random.bernoulli(k1, p=0.35, shape=(2, 1, 16, 16)).astype(jnp.float32)
    y1 = jax.block_until_ready(game_of_life(x1))
    r1 = jax.block_until_ready(_reference(x1))
    assert y1.shape == x1.shape and y1.dtype == jnp.float32
    assert np.array_equal(np.asarray(y1), np.asarray(r1))

    # Case 2: N not a multiple of 128 and multi-step grid (pad path, pipeline,
    # v7x two-core split).
    x2 = jax.random.bernoulli(k2, p=0.35, shape=(300, 1, 16, 16)).astype(jnp.float32)
    y2 = jax.block_until_ready(game_of_life(x2, vmem_block_bytes=64 * 1024))
    r2 = jax.block_until_ready(_reference(x2))
    assert np.array_equal(np.asarray(y2), np.asarray(r2))

    # Case 3: lane-aligned boards (native zero-copy path, ragged last block).
    x3 = jax.random.bernoulli(k3, p=0.35, shape=(5, 1, 8, 128)).astype(jnp.float32)
    y3 = jax.block_until_ready(game_of_life(x3))
    r3 = jax.block_until_ready(_reference(x3))
    assert np.array_equal(np.asarray(y3), np.asarray(r3))

    print("KERNEL_OK")
</pallas_src>

<mosaic_0001>
module attributes {stable_mosaic.version = 11 : i64} {
  func.func @kernel(%arg0: i32, %arg1: memref<16x16x128xf32, #tpu.memory_space<vmem>>, %arg2: memref<16x16x128xf32, #tpu.memory_space<vmem>>) attributes {dimension_semantics = [#tpu.dimension_semantics<parallel>], iteration_bounds = array<i64: 1>, scalar_prefetch = 0 : i64, scratch_operands = 0 : i64, tpu.core_type = #tpu.core_type<tc>, window_params = [{transform_indices = @transform_0, window_bounds = array<i64: 16, 16, 128>}, {transform_indices = @transform_1, window_bounds = array<i64: 16, 16, 128>}]} {
    %c0 = arith.constant 0 : index
    %c0_0 = arith.constant 0 : index
    %c0_1 = arith.constant 0 : index
    %0 = vector.load %arg1[%c0, %c0_0, %c0_1] : memref<16x16x128xf32, #tpu.memory_space<vmem>>, vector<16x16x128xf32>
    %1 = vector.extract_strided_slice %0 {offsets = [0, 15, 0], sizes = [16, 1, 128], strides = [1, 1, 1]} : vector<16x16x128xf32> to vector<16x1x128xf32>
    %2 = vector.extract_strided_slice %0 {offsets = [0, 0, 0], sizes = [16, 15, 128], strides = [1, 1, 1]} : vector<16x16x128xf32> to vector<16x15x128xf32>
    %3 = tpu.concatenate %1, %2 in 1 : vector<16x1x128xf32>, vector<16x15x128xf32> -> vector<16x16x128xf32>
    %4 = arith.addf %0, %3 : vector<16x16x128xf32>
    %5 = vector.extract_strided_slice %0 {offsets = [0, 1, 0], sizes = [16, 15, 128], strides = [1, 1, 1]} : vector<16x16x128xf32> to vector<16x15x128xf32>
    %6 = vector.extract_strided_slice %0 {offsets = [0, 0, 0], sizes = [16, 1, 128], strides = [1, 1, 1]} : vector<16x16x128xf32> to vector<16x1x128xf32>
    %7 = tpu.concatenate %5, %6 in 1 : vector<16x15x128xf32>, vector<16x1x128xf32> -> vector<16x16x128xf32>
    %8 = arith.addf %4, %7 : vector<16x16x128xf32>
    %9 = vector.extract_strided_slice %8 {offsets = [15, 0, 0], sizes = [1, 16, 128], strides = [1, 1, 1]} : vector<16x16x128xf32> to vector<1x16x128xf32>
    %10 = vector.extract_strided_slice %8 {offsets = [0, 0, 0], sizes = [15, 16, 128], strides = [1, 1, 1]} : vector<16x16x128xf32> to vector<15x16x128xf32>
    %11 = tpu.concatenate %9, %10 in 0 : vector<1x16x128xf32>, vector<15x16x128xf32> -> vector<16x16x128xf32>
    %12 = arith.addf %8, %11 : vector<16x16x128xf32>
    %13 = vector.extract_strided_slice %8 {offsets = [1, 0, 0], sizes = [15, 16, 128], strides = [1, 1, 1]} : vector<16x16x128xf32> to vector<15x16x128xf32>
    %14 = vector.extract_strided_slice %8 {offsets = [0, 0, 0], sizes = [1, 16, 128], strides = [1, 1, 1]} : vector<16x16x128xf32> to vector<1x16x128xf32>
    %15 = tpu.concatenate %13, %14 in 0 : vector<15x16x128xf32>, vector<1x16x128xf32> -> vector<16x16x128xf32>
    %16 = arith.addf %12, %15 : vector<16x16x128xf32>
    %cst = arith.constant -6.000000e-01 : f32
    %17 = vector.broadcast %cst : f32 to vector<16x16x128xf32>
    %18 = arith.mulf %17, %0 : vector<16x16x128xf32>
    %19 = arith.addf %16, %18 : vector<16x16x128xf32>
    %cst_2 = arith.constant 2.000000e+00 : f32
    %20 = vector.broadcast %cst_2 : f32 to vector<16x16x128xf32>
    %21 = arith.cmpf ogt, %19, %20 : vector<16x16x128xf32>
    %cst_3 = arith.constant 4.000000e+00 : f32
    %22 = vector.broadcast %cst_3 : f32 to vector<16x16x128xf32>
    %23 = arith.cmpf olt, %19, %22 : vector<16x16x128xf32>
    %24 = arith.andi %21, %23 : vector<16x16x128xi1>
    %25 = arith.extui %24 : vector<16x16x128xi1> to vector<16x16x128xi32>
    %26 = arith.sitofp %25 : vector<16x16x128xi32> to vector<16x16x128xf32>
    %c0_4 = arith.constant 0 : index
    %c0_5 = arith.constant 0 : index
    %c0_6 = arith.constant 0 : index
    %27 = vector.load %arg2[%c0_4, %c0_5, %c0_6] : memref<16x16x128xf32, #tpu.memory_space<vmem>>, vector<16x16x128xf32>
    tpu.vector_store %arg2[%c0_4, %c0_5, %c0_6], %26 {strides = array<i32>} : memref<16x16x128xf32, #tpu.memory_space<vmem>>, vector<16x16x128xf32>,
    return
  }
  func.func @transform_0(%arg0: i32) -> (i32, i32, i32) {
    %c0_i32 = arith.constant 0 : i32
    %c0_i32_0 = arith.constant 0 : i32
    %c0_i32_1 = arith.constant 0 : i32
    return %c0_i32, %c0_i32_0, %arg0 : i32, i32, i32
  }
  func.func @transform_1(%arg0: i32) -> (i32, i32, i32) {
    %c0_i32 = arith.constant 0 : i32
    %c0_i32_0 = arith.constant 0 : i32
    %c0_i32_1 = arith.constant 0 : i32
    return %c0_i32, %c0_i32_0, %arg0 : i32, i32, i32
  }
}

</mosaic_0001>

<bundles_post_ra>
// kernel: tpu_custom_call.1
= control target key start
LH: loop header
LB: loop body
LE: loop exit
PB: predicated region body
PF: predicated region fallthrough
CT: control target
= control target key end

     0   :  { %6 = vsyncpa [#allocation3], 0  ;;  %s1057_s0 = inlined_call_operand.hbm [shape: f32[16,16,128], index: 0, kind: input, shape index: {}]   ;;  %s1058_s1 = inlined_call_operand.hbm [shape: f32[16,16,128], index: 1, kind: output, shape index: {}]  }
   0x1   :  { %7 = vsyncpa [#allocation4], 0  ;;  %s12_s8 = sshll.u32 %s1057_s0, 4  ;;  %s807_s9 = smov [#allocation2]   ;;  %s13_s8 = int_to_ptr.hbm [resolvable:$true] %s12_s8 }
   0x2   :  { %s14_s10 = sshll.u32 %s807_s9, 4  ;;  %s808_s11 = smov 128   ;;  %s15_s10 = int_to_ptr.vmem [resolvable:$true] %s14_s10 }
   0x3   :  { %s809_s12 = smov 8  }
   0x4   :  { %20 = dma.hbm_to_vmem [thread:$0]  %s13_s8, 4096, %s15_s10, [#allocation3], %s808_s11, %s808_s11, %s809_s12  }
   0x5   :  { %803 = dma.done.wait [#allocation3], 4096  }
   0x6   :  { %804 = vsyncadd [#allocation3], 4294963200  ;;  %v25_v0 = vld [vmem:[#allocation2] sm:$0xff]  ;;  %v26_v1 = vld [vmem:[#allocation2 + $0x8] sm:$0xff]  ;;  %vm121_vm0 = vcmask 1040384   ;;  %vm234_vm1 = vcmask 1046528  }
   0x7   :  { %v27_v2 = vld [vmem:[#allocation2 + $0x10] sm:$0xff]  ;;  %v828_v3 = vld [vmem:[#allocation2 + $0x18] sm:$0xff]  ;;  %v73_v6 = vrot.slane %v26_v1, 7  ;;  %v122_v7 = vrot.slane %v25_v0, 7  ;;  %v235_v12 = vrot.slane %v25_v0, 1  ;;  %v236_v14 = vrot.slane %v26_v1, 1 }
   0x8   :  { %v830_v4 = vld [vmem:[#allocation2 + $0xf0] sm:$0xff]  ;;  %v832_v5 = vld [vmem:[#allocation2 + $0xf8] sm:$0xff]  ;;  %v124_v8 = vrot.slane %v27_v2, 7  ;;  %v74_v9 = vrot.slane %v828_v3, 7  ;;  %v238_v15 = vrot.slane %v27_v2, 1  ;;  %v239_v16 = vrot.slane %v828_v3, 1 }
   0x9   :  { %v88_v10 = vrot.slane %v832_v5, 7  ;;  %v152_v11 = vrot.slane %v830_v4, 7  ;;  %v186_v13 = vsel %vm121_vm0, %v73_v6, %v122_v7  ;;  %v280_v20 = vrot.slane %v830_v4, 1  ;;  %v851_v33 = vld [vmem:[#allocation2 + $0x28] sm:$0xff]  ;;  %v29_v38 = vld [vmem:[#allocation2 + $0x20] sm:$0xff]  ;;  %v873_v55 = vld [vmem:[#allocation2 + $0x30] sm:$0xff] }
   0xa   :  { %v187_v17 = vsel %vm121_vm0, %v74_v9, %v124_v8  ;;  %v202_v19 = vadd.f32 %v186_v13, %v25_v0  ;;  %v237_v23 = vsel %vm234_vm1, %v235_v12, %v236_v14  ;;  %v240_v24 = vsel %vm234_vm1, %v238_v15, %v239_v16  ;;  %v875_v56 = vld [vmem:[#allocation2 + $0x38] sm:$0xff]  ;;  %s811_s0 = smov [#allocation5]   ;;  %s705_s16 = sshll.u32 %s1058_s1, 4  ;;  %s706_s16 = int_to_ptr.hbm [resolvable:$true] %s705_s16 }
   0xb   :  { %v201_v18 = vsel %vm121_vm0, %v88_v10, %v152_v11  ;;  %v204_v21 = vadd.f32 %v187_v17, %v27_v2  ;;  %v281_v25 = vrot.slane %v832_v5, 1  ;;  %v443_v27 = vmul.f32 -0.6, %v25_v0  ;;  %s703_s13 = sshll.u32 %s811_s0, 4  ;;  %s704_s13 = int_to_ptr.vmem [resolvable:$true] %s703_s13 }
   0xc   :  { %v232_v22 = vadd.f32 %v201_v18, %v830_v4  ;;  %v846_v26 = vadd.f32 %v237_v23, %v202_v19  ;;  %v123_v28 = vsel %vm121_vm0, %v122_v7, %v73_v6  ;;  %v125_v30 = vsel %vm121_vm0, %v124_v8, %v74_v9 }
   0xd   :  { %v349_v29 = vadd.f32 %v240_v24, %v204_v21  ;;  %v153_v31 = vsel %vm121_vm0, %v152_v11, %v88_v10  ;;  %v203_v32 = vadd.f32 %v123_v28, %v26_v1  ;;  %v282_v34 = vsel %vm234_vm1, %v280_v20, %v281_v25  ;;  %v895_v24 = vld [vmem:[#allocation2 + $0x48] sm:$0xff] }
   0xe   :  { %v205_v35 = vadd.f32 %v125_v30, %v828_v3  ;;  %v233_v36 = vadd.f32 %v153_v31, %v832_v5  ;;  %v331_v37 = vsel %vm234_vm1, %v236_v14, %v235_v12  ;;  %v857_v39 = vadd.f32 %v282_v34, %v232_v22  ;;  %v33_v31 = vld [vmem:[#allocation2 + $0x40] sm:$0xff] }
   0xf   :  { %v332_v40 = vsel %vm234_vm1, %v239_v16, %v238_v15  ;;  %v346_v41 = vsel %vm234_vm1, %v281_v25, %v280_v20  ;;  %v861_v42 = vadd.f32 %v331_v37, %v203_v32  ;;  %v444_v45 = vmul.f32 -0.6, %v26_v1 }
  0x10   :  { %v350_v43 = vadd.f32 %v332_v40, %v205_v35  ;;  %v863_v44 = vadd.f32 %v346_v41, %v233_v36  ;;  %v75_v46 = vrot.slane %v851_v33, 7  ;;  %v379_v47 = vadd.f32 %v857_v39, %v846_v26 }
  0x11   :  { %v126_v48 = vrot.slane %v29_v38, 7  ;;  %v241_v49 = vrot.slane %v29_v38, 1  ;;  %v242_v50 = vrot.slane %v851_v33, 1  ;;  %v381_v52 = vadd.f32 %v349_v29, %v846_v26 }
  0x12   :  { %v380_v51 = vadd.f32 %v863_v44, %v861_v42  ;;  %v445_v53 = vmul.f32 -0.6, %v27_v2  ;;  %v382_v54 = vadd.f32 %v350_v43, %v861_v42  ;;  %v411_v57 = vadd.f32 %v379_v47, %v349_v29 }
  0x13   :  { %v188_v58 = vsel %vm121_vm0, %v75_v46, %v126_v48  ;;  %v243_v59 = vsel %vm234_vm1, %v241_v49, %v242_v50  ;;  %v127_v60 = vsel %vm121_vm0, %v126_v48, %v75_v46  ;;  %v333_v0 = vsel %vm234_vm1, %v242_v50, %v241_v49  ;;  %v910_v50 = vld [vmem:[#allocation2 + $0x58] sm:$0xff] }
  0x14   :  { %v412_v61 = vadd.f32 %v380_v51, %v350_v43  ;;  %v206_v62 = vadd.f32 %v188_v58, %v29_v38  ;;  %v207_v63 = vadd.f32 %v127_v60, %v851_v33  ;;  %v475_v1 = vadd.f32 %v443_v27, %v411_v57 }
  0x15   :  { %v446_v2 = vmul.f32 -0.6, %v828_v3  ;;  %v76_v6 = vrot.slane %v875_v56, 7  ;;  %v128_v7 = vrot.slane %v873_v55, 7  ;;  %v244_v11 = vrot.slane %v873_v55, 1 }
  0x16   :  { %v476_v8 = vadd.f32 %v444_v45, %v412_v61  ;;  %v351_v9 = vadd.f32 %v243_v59, %v206_v62  ;;  %v885_v10 = vadd.f32 %v333_v0, %v207_v63  ;;  %vm507_vm2 = vcmp.gt.f32.partialorder %v475_v1, 2.0 }
  0x17   :  { %vm539_vm3 = vcmp.lt.f32.partialorder %v475_v1, 4.0  ;;  %v189_v12 = vsel %vm121_vm0, %v76_v6, %v128_v7  ;;  %v245_v13 = vrot.slane %v875_v56, 1  ;;  %v810_v15 = vmov 0.0  }
  0x18   :  { %vm571_vm4 = vmand %vm507_vm2, %vm539_vm3  ;;  %vm508_vm5 = vcmp.gt.f32.partialorder %v476_v8, 2.0  ;;  %vm540_vm6 = vcmp.lt.f32.partialorder %v476_v8, 4.0  ;;  %v413_v3 = vadd.f32 %v381_v52, %v351_v9  ;;  %v414_v14 = vadd.f32 %v382_v54, %v885_v10 }
  0x19   :  { %v718_v16 = vsel %vm571_vm4, 1.0, %v810_v15  ;;  %vm572_vm7 = vmand %vm508_vm5, %vm540_vm6  ;;  %v208_v17 = vadd.f32 %v189_v12, %v873_v55  ;;  %v246_v18 = vsel %vm234_vm1, %v244_v11, %v245_v13  ;;  %v383_v19 = vadd.f32 %v351_v9, %v349_v29 }
  0x1a   :  { %667 = vst [vmem:[#allocation5] sm:$0xff] %v718_v16  ;;  %v719_v20 = vsel %vm572_vm7, 1.0, %v810_v15  ;;  %v477_v21 = vadd.f32 %v445_v53, %v413_v3  ;;  %v478_v22 = vadd.f32 %v446_v2, %v414_v14  ;;  %v447_v23 = vmul.f32 -0.6, %v29_v38  ;;  %v35_v53 = vld [vmem:[#allocation2 + $0x50] sm:$0xff]  ;;  %v923_v14 = vld [vmem:[#allocation2 + $0x68] sm:$0xff] }
  0x1b   :  { %668 = vst [vmem:[#allocation5 + $0x8] sm:$0xff] %v719_v20  ;;  %v353_v25 = vadd.f32 %v246_v18, %v208_v17  ;;  %v129_v27 = vsel %vm121_vm0, %v128_v7, %v76_v6  ;;  %v334_v28 = vsel %vm234_vm1, %v245_v13, %v244_v11  ;;  %v384_v30 = vadd.f32 %v885_v10, %v350_v43  ;;  %v37_v20 = vld [vmem:[#allocation2 + $0x60] sm:$0xff] }
  0x1c   :  { %vm509_vm8 = vcmp.gt.f32.partialorder %v477_v21, 2.0  ;;  %vm541_vm9 = vcmp.lt.f32.partialorder %v477_v21, 4.0  ;;  %vm510_vm10 = vcmp.gt.f32.partialorder %v478_v22, 2.0  ;;  %vm542_vm11 = vcmp.lt.f32.partialorder %v478_v22, 4.0 }
  0x1d   :  { %vm573_vm12 = vmand %vm509_vm8, %vm541_vm9  ;;  %v415_v29 = vadd.f32 %v383_v19, %v353_v25  ;;  %v209_v32 = vadd.f32 %v129_v27, %v875_v56  ;;  %v448_v34 = vmul.f32 -0.6, %v851_v33  ;;  %v77_v35 = vrot.slane %v895_v24, 7 }
  0x1e   :  { %v720_v36 = vsel %vm573_vm12, 1.0, %v810_v15  ;;  %vm574_vm13 = vmand %vm510_vm10, %vm542_vm11  ;;  %v130_v37 = vrot.slane %v33_v31, 7  ;;  %v247_v38 = vrot.slane %v33_v31, 1  ;;  %v248_v40 = vrot.slane %v895_v24, 1 }
  0x1f   :  { %669 = vst [vmem:[#allocation5 + $0x10] sm:$0xff] %v720_v36  ;;  %v721_v41 = vsel %vm574_vm13, 1.0, %v810_v15  ;;  %v479_v43 = vadd.f32 %v447_v23, %v415_v29  ;;  %v354_v45 = vadd.f32 %v334_v28, %v209_v32  ;;  %v385_v46 = vadd.f32 %v353_v25, %v351_v9 }
  0x20   :  { %670 = vst [vmem:[#allocation5 + $0x18] sm:$0xff] %v721_v41  ;;  %v190_v47 = vsel %vm121_vm0, %v77_v35, %v130_v37  ;;  %v249_v33 = vsel %vm234_vm1, %v247_v38, %v248_v40  ;;  %v449_v48 = vmul.f32 -0.6, %v873_v55  ;;  %v131_v49 = vsel %vm121_vm0, %v130_v37, %v77_v35 }
  0x21   :  { %vm511_vm14 = vcmp.gt.f32.partialorder %v479_v43, 2.0  ;;  %vm543_vm15 = vcmp.lt.f32.partialorder %v479_v43, 4.0  ;;  %v416_v51 = vadd.f32 %v384_v30, %v354_v45  ;;  %v210_v52 = vadd.f32 %v190_v47, %v33_v31  ;;  %v936_v47 = vld [vmem:[#allocation2 + $0x78] sm:$0xff] }
  0x22   :  { %vm575_vm2 = vmand %vm511_vm14, %vm543_vm15  ;;  %v211_v54 = vadd.f32 %v131_v49, %v895_v24  ;;  %v335_v57 = vsel %vm234_vm1, %v248_v40, %v247_v38  ;;  %v386_v58 = vadd.f32 %v354_v45, %v885_v10  ;;  %v450_v59 = vmul.f32 -0.6, %v875_v56 }
  0x23   :  { %v722_v55 = vsel %vm575_vm2, 1.0, %v810_v15  ;;  %v480_v60 = vadd.f32 %v448_v34, %v416_v51  ;;  %v355_v61 = vadd.f32 %v249_v33, %v210_v52  ;;  %v78_v62 = vrot.slane %v910_v50, 7 }
  0x24   :  { %671 = vst [vmem:[#allocation5 + $0x20] sm:$0xff] %v722_v55  ;;  %v356_v63 = vadd.f32 %v335_v57, %v211_v54  ;;  %v132_v0 = vrot.slane %v35_v53, 7  ;;  %v250_v1 = vrot.slane %v35_v53, 1  ;;  %v251_v2 = vrot.slane %v910_v50, 1 }
  0x25   :  { %vm512_vm3 = vcmp.gt.f32.partialorder %v480_v60, 2.0  ;;  %vm544_vm4 = vcmp.lt.f32.partialorder %v480_v60, 4.0  ;;  %v417_v6 = vadd.f32 %v385_v46, %v355_v61  ;;  %v387_v7 = vadd.f32 %v355_v61, %v353_v25  ;;  %v39_v46 = vld [vmem:[#allocation2 + $0x70] sm:$0xff] }
  0x26   :  { %vm576_vm5 = vmand %vm512_vm3, %vm544_vm4  ;;  %v418_v8 = vadd.f32 %v386_v58, %v356_v63  ;;  %v191_v56 = vsel %vm121_vm0, %v78_v62, %v132_v0  ;;  %v252_v9 = vsel %vm234_vm1, %v250_v1, %v251_v2  ;;  %v451_v10 = vmul.f32 -0.6, %v33_v31 }
  0x27   :  { %v723_v11 = vsel %vm576_vm5, 1.0, %v810_v15  ;;  %v481_v12 = vadd.f32 %v449_v48, %v417_v6  ;;  %v212_v13 = vadd.f32 %v191_v56, %v35_v53  ;;  %v133_v3 = vsel %vm121_vm0, %v132_v0, %v78_v62 }
  0x28   :  { %672 = vst [vmem:[#allocation5 + $0x28] sm:$0xff] %v723_v11  ;;  %v482_v16 = vadd.f32 %v450_v59, %v418_v8  ;;  %v213_v17 = vadd.f32 %v133_v3, %v910_v50  ;;  %v336_v18 = vsel %vm234_vm1, %v251_v2, %v250_v1  ;;  %v388_v19 = vadd.f32 %v356_v63, %v354_v45  ;;  %v41_v11 = vld [vmem:[#allocation2 + $0x80] sm:$0xff] }
  0x29   :  { %vm513_vm6 = vcmp.gt.f32.partialorder %v481_v12, 2.0  ;;  %vm545_vm7 = vcmp.lt.f32.partialorder %v481_v12, 4.0  ;;  %v357_v21 = vadd.f32 %v252_v9, %v212_v13  ;;  %v452_v22 = vmul.f32 -0.6, %v895_v24 }
  0x2a   :  { %vm577_vm8 = vmand %vm513_vm6, %vm545_vm7  ;;  %vm514_vm9 = vcmp.gt.f32.partialorder %v482_v16, 2.0  ;;  %vm546_vm10 = vcmp.lt.f32.partialorder %v482_v16, 4.0  ;;  %v358_v23 = vadd.f32 %v336_v18, %v213_v17  ;;  %v79_v25 = vrot.slane %v923_v14, 7 }
  0x2b   :  { %v724_v27 = vsel %vm577_vm8, 1.0, %v810_v15  ;;  %vm578_vm11 = vmand %vm514_vm9, %vm546_vm10  ;;  %v419_v28 = vadd.f32 %v387_v7, %v357_v21  ;;  %v134_v30 = vrot.slane %v37_v20, 7  ;;  %v253_v31 = vrot.slane %v37_v20, 1  ;;  %v42_v7 = vld [vmem:[#allocation2 + $0x88] sm:$0xff] }
  0x2c   :  { %673 = vst [vmem:[#allocation5 + $0x30] sm:$0xff] %v724_v27  ;;  %v725_v29 = vsel %vm578_vm11, 1.0, %v810_v15  ;;  %v420_v32 = vadd.f32 %v388_v19, %v358_v23  ;;  %v254_v34 = vrot.slane %v923_v14, 1  ;;  %v389_v35 = vadd.f32 %v357_v21, %v355_v61  ;;  %v952_v27 = vld [vmem:[#allocation2 + $0x98] sm:$0xff] }
  0x2d   :  { %674 = vst [vmem:[#allocation5 + $0x38] sm:$0xff] %v725_v29  ;;  %v483_v24 = vadd.f32 %v451_v10, %v419_v28  ;;  %v192_v36 = vsel %vm121_vm0, %v79_v25, %v134_v30  ;;  %v453_v37 = vmul.f32 -0.6, %v35_v53  ;;  %v135_v38 = vsel %vm121_vm0, %v134_v30, %v79_v25 }
  0x2e   :  { %v484_v40 = vadd.f32 %v452_v22, %v420_v32  ;;  %v214_v41 = vadd.f32 %v192_v36, %v37_v20  ;;  %v255_v43 = vsel %vm234_vm1, %v253_v31, %v254_v34  ;;  %v215_v45 = vadd.f32 %v135_v38, %v923_v14 }
  0x2f   :  { %vm515_vm12 = vcmp.gt.f32.partialorder %v483_v24, 2.0  ;;  %vm547_vm13 = vcmp.lt.f32.partialorder %v483_v24, 4.0  ;;  %v337_v33 = vsel %vm234_vm1, %v254_v34, %v253_v31  ;;  %v390_v48 = vadd.f32 %v358_v23, %v356_v63  ;;  %v43_v24 = vld [vmem:[#allocation2 + $0x90] sm:$0xff] }
  0x30   :  { %vm579_vm14 = vmand %vm515_vm12, %vm547_vm13  ;;  %vm516_vm15 = vcmp.gt.f32.partialorder %v484_v40, 2.0  ;;  %vm548_vm2 = vcmp.lt.f32.partialorder %v484_v40, 4.0  ;;  %v359_v49 = vadd.f32 %v255_v43, %v214_v41  ;;  %v360_v51 = vadd.f32 %v337_v33, %v215_v45 }
  0x31   :  { %v726_v52 = vsel %vm579_vm14, 1.0, %v810_v15  ;;  %vm580_vm3 = vmand %vm516_vm15, %vm548_vm2  ;;  %v454_v53 = vmul.f32 -0.6, %v910_v50  ;;  %v80_v54 = vrot.slane %v936_v47, 7  ;;  %v136_v57 = vrot.slane %v39_v46, 7 }
  0x32   :  { %675 = vst [vmem:[#allocation5 + $0x40] sm:$0xff] %v726_v52  ;;  %v727_v58 = vsel %vm580_vm3, 1.0, %v810_v15  ;;  %v421_v59 = vadd.f32 %v389_v35, %v359_v49  ;;  %v422_v55 = vadd.f32 %v390_v48, %v360_v51  ;;  %v256_v60 = vrot.slane %v39_v46, 1 }
  0x33   :  { %676 = vst [vmem:[#allocation5 + $0x48] sm:$0xff] %v727_v58  ;;  %v193_v61 = vsel %vm121_vm0, %v80_v54, %v136_v57  ;;  %v257_v62 = vrot.slane %v936_v47, 1  ;;  %v391_v63 = vadd.f32 %v359_v49, %v357_v21  ;;  %v455_v0 = vmul.f32 -0.6, %v37_v20  ;;  %v966_v58 = vld [vmem:[#allocation2 + $0xa8] sm:$0xff] }
  0x34   :  { %v485_v1 = vadd.f32 %v453_v37, %v421_v59  ;;  %v486_v2 = vadd.f32 %v454_v53, %v422_v55  ;;  %v216_v6 = vadd.f32 %v193_v61, %v39_v46  ;;  %v137_v50 = vsel %vm121_vm0, %v136_v57, %v80_v54  ;;  %v964_v57 = vld [vmem:[#allocation2 + $0xa0] sm:$0xff] }
  0x35   :  { %v258_v8 = vsel %vm234_vm1, %v256_v60, %v257_v62  ;;  %v217_v56 = vadd.f32 %v137_v50, %v936_v47  ;;  %v338_v9 = vsel %vm234_vm1, %v257_v62, %v256_v60  ;;  %v392_v10 = vadd.f32 %v360_v51, %v358_v23 }
  0x36   :  { %vm517_vm4 = vcmp.gt.f32.partialorder %v485_v1, 2.0  ;;  %vm549_vm5 = vcmp.lt.f32.partialorder %v485_v1, 4.0  ;;  %vm518_vm6 = vcmp.gt.f32.partialorder %v486_v2, 2.0  ;;  %vm550_vm7 = vcmp.lt.f32.partialorder %v486_v2, 4.0 }
  0x37   :  { %vm581_vm8 = vmand %vm517_vm4, %vm549_vm5  ;;  %v361_v12 = vadd.f32 %v258_v8, %v216_v6  ;;  %v362_v13 = vadd.f32 %v338_v9, %v217_v56  ;;  %v456_v3 = vmul.f32 -0.6, %v923_v14  ;;  %v81_v16 = vrot.slane %v42_v7, 7 }
  0x38   :  { %v728_v17 = vsel %vm581_vm8, 1.0, %v810_v15  ;;  %vm582_vm9 = vmand %vm518_vm6, %vm550_vm7  ;;  %v138_v18 = vrot.slane %v41_v11, 7  ;;  %v259_v19 = vrot.slane %v41_v11, 1  ;;  %v260_v20 = vrot.slane %v42_v7, 1 }
  0x39   :  { %677 = vst [vmem:[#allocation5 + $0x50] sm:$0xff] %v728_v17  ;;  %v729_v21 = vsel %vm582_vm9, 1.0, %v810_v15  ;;  %v423_v22 = vadd.f32 %v391_v63, %v361_v12  ;;  %v424_v23 = vadd.f32 %v392_v10, %v362_v13  ;;  %v393_v25 = vadd.f32 %v361_v12, %v359_v49 }
  0x3a   :  { %678 = vst [vmem:[#allocation5 + $0x58] sm:$0xff] %v729_v21  ;;  %v194_v28 = vsel %vm121_vm0, %v81_v16, %v138_v18  ;;  %v261_v14 = vsel %vm234_vm1, %v259_v19, %v260_v20  ;;  %v457_v30 = vmul.f32 -0.6, %v39_v46  ;;  %v139_v31 = vsel %vm121_vm0, %v138_v18, %v81_v16  ;;  %v982_v21 = vld [vmem:[#allocation2 + $0xb8] sm:$0xff] }
  0x3b   :  { %v487_v29 = vadd.f32 %v455_v0, %v423_v22  ;;  %v488_v32 = vadd.f32 %v456_v3, %v424_v23  ;;  %v218_v34 = vadd.f32 %v194_v28, %v41_v11  ;;  %v219_v35 = vadd.f32 %v139_v31, %v42_v7 }
  0x3c   :  { %v339_v36 = vsel %vm234_vm1, %v260_v20, %v259_v19  ;;  %v394_v37 = vadd.f32 %v362_v13, %v360_v51  ;;  %v458_v38 = vmul.f32 -0.6, %v936_v47  ;;  %v82_v40 = vrot.slane %v952_v27, 7  ;;  %v980_v20 = vld [vmem:[#allocation2 + $0xb0] sm:$0xff] }
  0x3d   :  { %vm519_vm10 = vcmp.gt.f32.partialorder %v487_v29, 2.0  ;;  %vm551_vm11 = vcmp.lt.f32.partialorder %v487_v29, 4.0  ;;  %vm520_vm12 = vcmp.gt.f32.partialorder %v488_v32, 2.0  ;;  %vm552_vm13 = vcmp.lt.f32.partialorder %v488_v32, 4.0 }
  0x3e   :  { %vm583_vm14 = vmand %vm519_vm10, %vm551_vm11  ;;  %v363_v41 = vadd.f32 %v261_v14, %v218_v34  ;;  %v364_v43 = vadd.f32 %v339_v36, %v219_v35  ;;  %v140_v45 = vrot.slane %v43_v24, 7  ;;  %v262_v46 = vrot.slane %v43_v24, 1 }
  0x3f   :  { %v730_v33 = vsel %vm583_vm14, 1.0, %v810_v15  ;;  %vm584_vm15 = vmand %vm520_vm12, %vm552_vm13  ;;  %v263_v48 = vrot.slane %v952_v27, 1  ;;  %v459_v49 = vmul.f32 -0.6, %v41_v11  ;;  %v460_v51 = vmul.f32 -0.6, %v42_v7 }
  0x40   :  { %679 = vst [vmem:[#allocation5 + $0x60] sm:$0xff] %v730_v33  ;;  %v731_v47 = vsel %vm584_vm15, 1.0, %v810_v15  ;;  %v425_v52 = vadd.f32 %v393_v25, %v363_v41  ;;  %v426_v53 = vadd.f32 %v394_v37, %v364_v43  ;;  %v195_v54 = vsel %vm121_vm0, %v82_v40, %v140_v45 }
  0x41   :  { %680 = vst [vmem:[#allocation5 + $0x68] sm:$0xff] %v731_v47  ;;  %v220_v59 = vadd.f32 %v195_v54, %v43_v24  ;;  %v264_v55 = vsel %vm234_vm1, %v262_v46, %v263_v48  ;;  %v395_v60 = vadd.f32 %v363_v41, %v361_v12  ;;  %v141_v61 = vsel %vm121_vm0, %v140_v45, %v82_v40 }
  0x42   :  { %v489_v62 = vadd.f32 %v457_v30, %v425_v52  ;;  %v490_v63 = vadd.f32 %v458_v38, %v426_v53  ;;  %v221_v0 = vadd.f32 %v141_v61, %v952_v27  ;;  %v340_v1 = vsel %vm234_vm1, %v263_v48, %v262_v46  ;;  %v49_v53 = vld [vmem:[#allocation2 + $0xc0] sm:$0xff] }
  0x43   :  { %v365_v2 = vadd.f32 %v264_v55, %v220_v59  ;;  %v396_v6 = vadd.f32 %v364_v43, %v362_v13  ;;  %v83_v50 = vrot.slane %v966_v58, 7  ;;  %v142_v7 = vrot.slane %v964_v57, 7 }
  0x44   :  { %vm521_vm2 = vcmp.gt.f32.partialorder %v489_v62, 2.0  ;;  %vm553_vm3 = vcmp.lt.f32.partialorder %v489_v62, 4.0  ;;  %vm522_vm4 = vcmp.gt.f32.partialorder %v490_v63, 2.0  ;;  %vm554_vm5 = vcmp.lt.f32.partialorder %v490_v63, 4.0 }
  0x45   :  { %vm585_vm6 = vmand %vm521_vm2, %vm553_vm3  ;;  %v427_v8 = vadd.f32 %v395_v60, %v365_v2  ;;  %v366_v56 = vadd.f32 %v340_v1, %v221_v0  ;;  %v196_v9 = vsel %vm121_vm0, %v83_v50, %v142_v7  ;;  %v265_v10 = vrot.slane %v964_v57, 1 }
  0x46   :  { %v732_v11 = vsel %vm585_vm6, 1.0, %v810_v15  ;;  %vm586_vm7 = vmand %vm522_vm4, %vm554_vm5  ;;  %v222_v12 = vadd.f32 %v196_v9, %v964_v57  ;;  %v266_v13 = vrot.slane %v966_v58, 1  ;;  %v397_v3 = vadd.f32 %v365_v2, %v363_v41 }
  0x47   :  { %681 = vst [vmem:[#allocation5 + $0x70] sm:$0xff] %v732_v11  ;;  %v733_v16 = vsel %vm586_vm7, 1.0, %v810_v15  ;;  %v491_v17 = vadd.f32 %v459_v49, %v427_v8  ;;  %v428_v18 = vadd.f32 %v396_v6, %v366_v56  ;;  %v461_v19 = vmul.f32 -0.6, %v43_v24 }
  0x48   :  { %682 = vst [vmem:[#allocation5 + $0x78] sm:$0xff] %v733_v16  ;;  %v267_v22 = vsel %vm234_vm1, %v265_v10, %v266_v13  ;;  %v143_v23 = vsel %vm121_vm0, %v142_v7, %v83_v50  ;;  %v341_v25 = vsel %vm234_vm1, %v266_v13, %v265_v10  ;;  %v398_v28 = vadd.f32 %v366_v56, %v364_v43  ;;  %v1012_v13 = vld [vmem:[#allocation2 + $0xd8] sm:$0xff] }
  0x49   :  { %vm523_vm8 = vcmp.gt.f32.partialorder %v491_v17, 2.0  ;;  %vm555_vm9 = vcmp.lt.f32.partialorder %v491_v17, 4.0  ;;  %v492_v14 = vadd.f32 %v460_v51, %v428_v18  ;;  %v367_v30 = vadd.f32 %v267_v22, %v222_v12  ;;  %v1000_v51 = vld [vmem:[#allocation2 + $0xc8] sm:$0xff]  ;;  %v51_v12 = vld [vmem:[#allocation2 + $0xd0] sm:$0xff] }
  0x4a   :  { %vm587_vm10 = vmand %vm523_vm8, %vm555_vm9  ;;  %v223_v31 = vadd.f32 %v143_v23, %v966_v58  ;;  %v462_v29 = vmul.f32 -0.6, %v952_v27  ;;  %v84_v32 = vrot.slane %v982_v21, 7  ;;  %v144_v34 = vrot.slane %v980_v20, 7 }
  0x4b   :  { %v734_v35 = vsel %vm587_vm10, 1.0, %v810_v15  ;;  %vm524_vm11 = vcmp.gt.f32.partialorder %v492_v14, 2.0  ;;  %vm556_vm12 = vcmp.lt.f32.partialorder %v492_v14, 4.0  ;;  %v429_v24 = vadd.f32 %v397_v3, %v367_v30 }
  0x4c   :  { %683 = vst [vmem:[#allocation5 + $0x80] sm:$0xff] %v734_v35  ;;  %vm588_vm13 = vmand %vm524_vm11, %vm556_vm12  ;;  %v368_v36 = vadd.f32 %v341_v25, %v223_v31  ;;  %v197_v37 = vsel %vm121_vm0, %v84_v32, %v144_v34  ;;  %v268_v38 = vrot.slane %v980_v20, 1  ;;  %v269_v40 = vrot.slane %v982_v21, 1 }
  0x4d   :  { %v735_v27 = vsel %vm588_vm13, 1.0, %v810_v15  ;;  %v493_v41 = vadd.f32 %v461_v19, %v429_v24  ;;  %v224_v43 = vadd.f32 %v197_v37, %v980_v20  ;;  %v399_v45 = vadd.f32 %v367_v30, %v365_v2 }
  0x4e   :  { %684 = vst [vmem:[#allocation5 + $0x88] sm:$0xff] %v735_v27  ;;  %v430_v46 = vadd.f32 %v398_v28, %v368_v36  ;;  %v270_v33 = vsel %vm234_vm1, %v268_v38, %v269_v40  ;;  %v463_v48 = vmul.f32 -0.6, %v964_v57  ;;  %v145_v49 = vsel %vm121_vm0, %v144_v34, %v84_v32 }
  0x4f   :  { %vm525_vm14 = vcmp.gt.f32.partialorder %v493_v41, 2.0  ;;  %vm557_vm15 = vcmp.lt.f32.partialorder %v493_v41, 4.0  ;;  %v369_v47 = vadd.f32 %v270_v33, %v224_v43  ;;  %v225_v52 = vadd.f32 %v145_v49, %v982_v21 }
  0x50   :  { %vm589_vm2 = vmand %vm525_vm14, %vm557_vm15  ;;  %v494_v54 = vadd.f32 %v462_v29, %v430_v46  ;;  %v342_v59 = vsel %vm234_vm1, %v269_v40, %v268_v38  ;;  %v400_v55 = vadd.f32 %v368_v36, %v366_v56  ;;  %v464_v60 = vmul.f32 -0.6, %v966_v58  ;;  %v54_v40 = vld [vmem:[#allocation2 + $0xe8] sm:$0xff]  ;;  %v53_v46 = vld [vmem:[#allocation2 + $0xe0] sm:$0xff] }
  0x51   :  { %v736_v61 = vsel %vm589_vm2, 1.0, %v810_v15  ;;  %v431_v57 = vadd.f32 %v399_v45, %v369_v47  ;;  %v370_v62 = vadd.f32 %v342_v59, %v225_v52  ;;  %v85_v63 = vrot.slane %v1000_v51, 7 }
  0x52   :  { %685 = vst [vmem:[#allocation5 + $0x90] sm:$0xff] %v736_v61  ;;  %vm526_vm3 = vcmp.gt.f32.partialorder %v494_v54, 2.0  ;;  %vm558_vm4 = vcmp.lt.f32.partialorder %v494_v54, 4.0  ;;  %v146_v0 = vrot.slane %v49_v53, 7  ;;  %v271_v1 = vrot.slane %v49_v53, 1 }
  0x53   :  { %vm590_vm5 = vmand %vm526_vm3, %vm558_vm4  ;;  %v495_v2 = vadd.f32 %v463_v48, %v431_v57  ;;  %v432_v6 = vadd.f32 %v400_v55, %v370_v62  ;;  %v272_v50 = vrot.slane %v1000_v51, 1  ;;  %v401_v7 = vadd.f32 %v369_v47, %v367_v30 }
  0x54   :  { %v737_v8 = vsel %vm590_vm5, 1.0, %v810_v15  ;;  %v198_v58 = vsel %vm121_vm0, %v85_v63, %v146_v0  ;;  %v465_v56 = vmul.f32 -0.6, %v980_v20  ;;  %v147_v9 = vsel %vm121_vm0, %v146_v0, %v85_v63 }
  0x55   :  { %686 = vst [vmem:[#allocation5 + $0x98] sm:$0xff] %v737_v8  ;;  %vm527_vm6 = vcmp.gt.f32.partialorder %v495_v2, 2.0  ;;  %vm559_vm7 = vcmp.lt.f32.partialorder %v495_v2, 4.0  ;;  %v496_v10 = vadd.f32 %v464_v60, %v432_v6  ;;  %v226_v11 = vadd.f32 %v198_v58, %v49_v53 }
  0x56   :  { %vm591_vm8 = vmand %vm527_vm6, %vm559_vm7  ;;  %v273_v3 = vsel %vm234_vm1, %v271_v1, %v272_v50  ;;  %v227_v16 = vadd.f32 %v147_v9, %v1000_v51  ;;  %v343_v17 = vsel %vm234_vm1, %v272_v50, %v271_v1  ;;  %v402_v18 = vadd.f32 %v370_v62, %v368_v36 }
  0x57   :  { %v738_v19 = vsel %vm591_vm8, 1.0, %v810_v15  ;;  %vm528_vm9 = vcmp.gt.f32.partialorder %v496_v10, 2.0  ;;  %vm560_vm10 = vcmp.lt.f32.partialorder %v496_v10, 4.0  ;;  %v371_v20 = vadd.f32 %v273_v3, %v226_v11 }
  0x58   :  { %687 = vst [vmem:[#allocation5 + $0xa0] sm:$0xff] %v738_v19  ;;  %vm592_vm11 = vmand %vm528_vm9, %vm560_vm10  ;;  %v372_v22 = vadd.f32 %v343_v17, %v227_v16  ;;  %v466_v23 = vmul.f32 -0.6, %v982_v21  ;;  %v86_v25 = vrot.slane %v1012_v13, 7  ;;  %v148_v28 = vrot.slane %v51_v12, 7 }
  0x59   :  { %v739_v14 = vsel %vm592_vm11, 1.0, %v810_v15  ;;  %v433_v30 = vadd.f32 %v401_v7, %v371_v20  ;;  %v274_v31 = vrot.slane %v51_v12, 1  ;;  %v275_v29 = vrot.slane %v1012_v13, 1 }
  0x5a   :  { %688 = vst [vmem:[#allocation5 + $0xa8] sm:$0xff] %v739_v14  ;;  %v434_v32 = vadd.f32 %v402_v18, %v372_v22  ;;  %v199_v34 = vsel %vm121_vm0, %v86_v25, %v148_v28  ;;  %v403_v35 = vadd.f32 %v371_v20, %v369_v47  ;;  %v467_v24 = vmul.f32 -0.6, %v49_v53 }
  0x5b   :  { %v497_v36 = vadd.f32 %v465_v56, %v433_v30  ;;  %v228_v37 = vadd.f32 %v199_v34, %v51_v12  ;;  %v276_v38 = vsel %vm234_vm1, %v274_v31, %v275_v29  ;;  %v149_v21 = vsel %vm121_vm0, %v148_v28, %v86_v25 }
  0x5c   :  { %v498_v27 = vadd.f32 %v466_v23, %v434_v32  ;;  %v229_v41 = vadd.f32 %v149_v21, %v1012_v13  ;;  %v344_v43 = vsel %vm234_vm1, %v275_v29, %v274_v31  ;;  %v404_v45 = vadd.f32 %v372_v22, %v370_v62 }
  0x5d   :  { %vm529_vm12 = vcmp.gt.f32.partialorder %v497_v36, 2.0  ;;  %vm561_vm13 = vcmp.lt.f32.partialorder %v497_v36, 4.0  ;;  %v373_v33 = vadd.f32 %v276_v38, %v228_v37  ;;  %v468_v48 = vmul.f32 -0.6, %v1000_v51 }
  0x5e   :  { %vm593_vm14 = vmand %vm529_vm12, %vm561_vm13  ;;  %vm530_vm15 = vcmp.gt.f32.partialorder %v498_v27, 2.0  ;;  %vm562_vm2 = vcmp.lt.f32.partialorder %v498_v27, 4.0  ;;  %v374_v49 = vadd.f32 %v344_v43, %v229_v41  ;;  %v87_v47 = vrot.slane %v54_v40, 7 }
  0x5f   :  { %v740_v52 = vsel %vm593_vm14, 1.0, %v810_v15  ;;  %vm594_vm3 = vmand %vm530_vm15, %vm562_vm2  ;;  %v435_v53 = vadd.f32 %v403_v35, %v373_v33  ;;  %v150_v54 = vrot.slane %v53_v46, 7  ;;  %v277_v59 = vrot.slane %v53_v46, 1 }
  0x60   :  { %689 = vst [vmem:[#allocation5 + $0xb0] sm:$0xff] %v740_v52  ;;  %v741_v55 = vsel %vm594_vm3, 1.0, %v810_v15  ;;  %v436_v60 = vadd.f32 %v404_v45, %v374_v49  ;;  %v278_v61 = vrot.slane %v54_v40, 1  ;;  %v405_v57 = vadd.f32 %v373_v33, %v371_v20 }
  0x61   :  { %690 = vst [vmem:[#allocation5 + $0xb8] sm:$0xff] %v741_v55  ;;  %v499_v62 = vadd.f32 %v467_v24, %v435_v53  ;;  %v200_v51 = vsel %vm121_vm0, %v87_v47, %v150_v54  ;;  %v469_v63 = vmul.f32 -0.6, %v51_v12  ;;  %v151_v0 = vsel %vm121_vm0, %v150_v54, %v87_v47 }
  0x62   :  { %v500_v1 = vadd.f32 %v468_v48, %v436_v60  ;;  %v230_v2 = vadd.f32 %v200_v51, %v53_v46  ;;  %v279_v6 = vsel %vm234_vm1, %v277_v59, %v278_v61  ;;  %v231_v50 = vadd.f32 %v151_v0, %v54_v40 }
  0x63   :  { %vm531_vm4 = vcmp.gt.f32.partialorder %v499_v62, 2.0  ;;  %vm563_vm5 = vcmp.lt.f32.partialorder %v499_v62, 4.0  ;;  %v345_v7 = vsel %vm234_vm1, %v278_v61, %v277_v59  ;;  %v406_v8 = vadd.f32 %v374_v49, %v372_v22 }
  0x64   :  { %vm595_vm6 = vmand %vm531_vm4, %vm563_vm5  ;;  %vm532_vm7 = vcmp.gt.f32.partialorder %v500_v1, 2.0  ;;  %vm564_vm8 = vcmp.lt.f32.partialorder %v500_v1, 4.0  ;;  %v375_v58 = vadd.f32 %v279_v6, %v230_v2  ;;  %v376_v56 = vadd.f32 %v345_v7, %v231_v50 }
  0x65   :  { %v742_v9 = vsel %vm595_vm6, 1.0, %v810_v15  ;;  %vm596_vm9 = vmand %vm532_vm7, %vm564_vm8  ;;  %v470_v10 = vmul.f32 -0.6, %v1012_v13  ;;  %v471_v11 = vmul.f32 -0.6, %v53_v46 }
  0x66   :  { %691 = vst [vmem:[#allocation5 + $0xc0] sm:$0xff] %v742_v9  ;;  %v743_v12 = vsel %vm596_vm9, 1.0, %v810_v15  ;;  %v437_v3 = vadd.f32 %v405_v57, %v375_v58  ;;  %v438_v16 = vadd.f32 %v406_v8, %v376_v56  ;;  %v407_v17 = vadd.f32 %v375_v58, %v373_v33 }
  0x67   :  { %692 = vst [vmem:[#allocation5 + $0xc8] sm:$0xff] %v743_v12  ;;  %v408_v18 = vadd.f32 %v376_v56, %v374_v49  ;;  %v472_v19 = vmul.f32 -0.6, %v54_v40  ;;  %v409_v20 = vadd.f32 %v857_v39, %v375_v58  ;;  %v473_v22 = vmul.f32 -0.6, %v830_v4 }
  0x68   :  { %v501_v23 = vadd.f32 %v469_v63, %v437_v3  ;;  %v502_v25 = vadd.f32 %v470_v10, %v438_v16  ;;  %v439_v28 = vadd.f32 %v407_v17, %v857_v39  ;;  %v410_v13 = vadd.f32 %v863_v44, %v376_v56 }
  0x69   :  { %v440_v14 = vadd.f32 %v408_v18, %v863_v44  ;;  %v441_v30 = vadd.f32 %v409_v20, %v846_v26  ;;  %v474_v31 = vmul.f32 -0.6, %v832_v5 }
  0x6a   :  { %vm533_vm0 = vcmp.gt.f32.partialorder %v501_v23, 2.0  ;;  %vm565_vm1 = vcmp.lt.f32.partialorder %v501_v23, 4.0  ;;  %vm534_vm10 = vcmp.gt.f32.partialorder %v502_v25, 2.0  ;;  %vm566_vm11 = vcmp.lt.f32.partialorder %v502_v25, 4.0 }
  0x6b   :  { %vm597_vm12 = vmand %vm533_vm0, %vm565_vm1  ;;  %v503_v29 = vadd.f32 %v471_v11, %v439_v28  ;;  %v504_v32 = vadd.f32 %v472_v19, %v440_v14  ;;  %v505_v4 = vadd.f32 %v473_v22, %v441_v30  ;;  %v442_v34 = vadd.f32 %v410_v13, %v861_v42 }
  0x6c   :  { %v744_v39 = vsel %vm597_vm12, 1.0, %v810_v15  ;;  %vm598_vm13 = vmand %vm534_vm10, %vm566_vm11 }
  0x6d   :  { %693 = vst [vmem:[#allocation5 + $0xd0] sm:$0xff] %v744_v39  ;;  %v745_v44 = vsel %vm598_vm13, 1.0, %v810_v15  ;;  %vm535_vm14 = vcmp.gt.f32.partialorder %v503_v29, 2.0  ;;  %vm567_vm15 = vcmp.lt.f32.partialorder %v503_v29, 4.0  ;;  %vm536_vm2 = vcmp.gt.f32.partialorder %v504_v32, 2.0 }
  0x6e   :  { %694 = vst [vmem:[#allocation5 + $0xd8] sm:$0xff] %v745_v44  ;;  %vm599_vm3 = vmand %vm535_vm14, %vm567_vm15  ;;  %vm568_vm4 = vcmp.lt.f32.partialorder %v504_v32, 4.0  ;;  %vm537_vm5 = vcmp.gt.f32.partialorder %v505_v4, 2.0  ;;  %vm569_vm6 = vcmp.lt.f32.partialorder %v505_v4, 4.0  ;;  %v506_v5 = vadd.f32 %v474_v31, %v442_v34 }
  0x6f   :  { %v746_v26 = vsel %vm599_vm3, 1.0, %v810_v15  ;;  %vm600_vm7 = vmand %vm536_vm2, %vm568_vm4 }
  0x70   :  { %695 = vst [vmem:[#allocation5 + $0xe0] sm:$0xff] %v746_v26  ;;  %v747_v42 = vsel %vm600_vm7, 1.0, %v810_v15  ;;  %vm601_vm8 = vmand %vm537_vm5, %vm569_vm6  ;;  %vm538_vm9 = vcmp.gt.f32.partialorder %v506_v5, 2.0  ;;  %vm570_vm0 = vcmp.lt.f32.partialorder %v506_v5, 4.0 }
  0x71   :  { %696 = vst [vmem:[#allocation5 + $0xe8] sm:$0xff] %v747_v42  ;;  %v748_v35 = vsel %vm601_vm8, 1.0, %v810_v15  ;;  %vm602_vm1 = vmand %vm538_vm9, %vm570_vm0 }
  0x72   :  { %697 = vst [vmem:[#allocation5 + $0xf0] sm:$0xff] %v748_v35  ;;  %v749_v24 = vsel %vm602_vm1, 1.0, %v810_v15 }
  0x73   :  { %698 = vst [vmem:[#allocation5 + $0xf8] sm:$0xff] %v749_v24 }
  0x74   :  { %711 = dma.vmem_to_hbm [thread:$0]  %s704_s13, 4096, %s706_s16, [#allocation4], %s808_s11, %s808_s11, %s809_s12  }
  0x75   :  { %805 = dma.done.wait [#allocation4], 4096  }
  0x76   :  { %806 = vsyncadd [#allocation4], 4294963200 }
  0x77   :  { %716 = vsyncpa [#allocation3], 1 }
  0x78   :  { %717 = vsyncpa [#allocation4], 1 }

</bundles_post_ra>
